<compile_context>
chip_gen: v6e
topology: v6e:2x2x1
jax: 0.10.0
libtpu: 0.0.40
codegen_flags: <defaults>
</compile_context>

<pallas_src>
import jax
import jax.numpy as jnp
from jax.experimental import pallas as pl
from jax.experimental.pallas import tpu as pltpu

IN_DIM, H1_DIM, H2_DIM, OUT_DIM = 2, 10, 50, 4


def _mlp_softmax_kernel(x_ref, w1_ref, w2_ref, b2_ref, w3_ref, o_ref):
    """One batch tile; batch sits on the lane axis.

    x_ref  : (2,  TB)  bf16  (x transposed)
    w1_ref : (10, 2)   bf16  fc1.weight  (PyTorch (out, in) layout)
    w2_ref : (50, 10)  bf16  fc2.weight
    b2_ref : (50, 1)   bf16  fc2.bias
    w3_ref : (4,  50)  bf16  fc3.weight
    o_ref  : (4,  TB)  f32   softmax probabilities (transposed)
    """
    f32 = jnp.float32
    x = x_ref[...].astype(f32)                     # (2, TB)
    w1 = w1_ref[...].astype(f32)                   # (10, 2)

    # fc1 (contraction depth 2, no bias): two broadcasted FMAs on the VPU.
    h1 = w1[:, 0:1] * x[0:1, :] + w1[:, 1:2] * x[1:2, :]        # (10, TB)
    h1 = jnp.maximum(h1, 0.0)

    # fc2 (10 -> 50) + bias + ReLU, f32 accumulate on the MXU.
    h2 = jnp.dot(w2_ref[...].astype(f32), h1,
                 preferred_element_type=f32)                     # (50, TB)
    h2 = jnp.maximum(h2 + b2_ref[...].astype(f32), 0.0)

    # fc3 (50 -> 4), no bias.
    logits = jnp.dot(w3_ref[...].astype(f32), h2,
                     preferred_element_type=f32)                 # (4, TB)

    # Numerically stable softmax over the feature axis (axis 0 here).
    m = jnp.max(logits, axis=0, keepdims=True)
    e = jnp.exp(logits - m)
    denom = jnp.sum(e, axis=0, keepdims=True)
    # approx=True routes the divide to the otherwise-idle EUP slot.
    o_ref[...] = (e * pl.reciprocal(denom, approx=True)).astype(o_ref.dtype)


def _round_up(n, m):
    return ((n + m - 1) // m) * m


def net_forward_pallas(x, params, *, tile_b=1024, storage_dtype=jnp.bfloat16):
    """x: (B, 2) float32; params in PyTorch layout. Returns (B, 4) float32."""
    w1, w2, b2, w3 = params["w1"], params["w2"], params["b2"], params["w3"]
    B = x.shape[0]

    # Lane tile must be a multiple of 128; pad the batch in the wrapper
    # (softmax is row-independent, padded columns are sliced off).
    tb = min(tile_b, _round_up(max(B, 1), 128))
    b_pad = _round_up(B, tb)

    # Batch on the lane axis, bf16 storage.
    xt = jnp.zeros((IN_DIM, b_pad), storage_dtype)
    xt = xt.at[:, :B].set(x.T.astype(storage_dtype))

    w1s = w1.astype(storage_dtype)                       # (10, 2)
    w2s = w2.astype(storage_dtype)                       # (50, 10)
    b2s = b2.reshape(H2_DIM, 1).astype(storage_dtype)    # (50, 1)
    w3s = w3.astype(storage_dtype)                       # (4, 50)

    out_t = pl.pallas_call(
        _mlp_softmax_kernel,
        out_shape=jax.ShapeDtypeStruct((OUT_DIM, b_pad), jnp.float32),
        grid=(b_pad // tb,),
        in_specs=[
            pl.BlockSpec((IN_DIM, tb), lambda i: (0, i)),        # x tile
            pl.BlockSpec((H1_DIM, IN_DIM), lambda i: (0, 0)),    # w1 (resident)
            pl.BlockSpec((H2_DIM, H1_DIM), lambda i: (0, 0)),    # w2 (resident)
            pl.BlockSpec((H2_DIM, 1), lambda i: (0, 0)),         # b2 (resident)
            pl.BlockSpec((OUT_DIM, H2_DIM), lambda i: (0, 0)),   # w3 (resident)
        ],
        out_specs=pl.BlockSpec((OUT_DIM, tb), lambda i: (0, i)),
        compiler_params=pltpu.CompilerParams(
            dimension_semantics=("parallel",)),
    )(xt, w1s, w2s, b2s, w3s)

    return out_t[:, :B].T                                 # back to (B, 4)


def net_forward_ref(x, params):
    """Plain-JAX forward (used for tiny batches and for correctness checks)."""
    w1, w2, b2, w3 = params["w1"], params["w2"], params["b2"], params["w3"]
    h1 = jnp.maximum(x @ w1.T, 0.0)
    h2 = jnp.maximum(h1 @ w2.T + b2, 0.0)
    logits = h2 @ w3.T
    return jax.nn.softmax(logits, axis=1)


def net_forward(x, params, use_pallas=None):
    # For tiny batches the fixed pallas_call + DMA overhead dominates; let
    # XLA fuse the three matmuls + softmax instead (perf-review item).
    if use_pallas is None:
        use_pallas = x.shape[0] >= 512
    if use_pallas:
        return net_forward_pallas(x, params)
    return net_forward_ref(x, params)


def init_params(key):
    # Deterministic init mimicking nn.Linear's U(-1/sqrt(fan_in), 1/sqrt(fan_in)),
    # weights kept in PyTorch (out, in) layout.
    k1, k2, k2b, k3 = jax.random.split(key, 4)

    def uinit(k, shape, fan_in):
        bound = 1.0 / jnp.sqrt(fan_in)
        return jax.random.uniform(k, shape, jnp.float32, -bound, bound)

    return {
        "w1": uinit(k1, (H1_DIM, IN_DIM), float(IN_DIM)),     # fc1.weight (10, 2)
        "w2": uinit(k2, (H2_DIM, H1_DIM), float(H1_DIM)),     # fc2.weight (50, 10)
        "b2": uinit(k2b, (H2_DIM,), float(H1_DIM)),           # fc2.bias   (50,)
        "w3": uinit(k3, (OUT_DIM, H2_DIM), float(H2_DIM)),    # fc3.weight (4, 50)
    }


if __name__ == "__main__":
    key = jax.random.PRNGKey(0)
    kx, kp = jax.random.split(key)

    B = 8
    x = jax.random.normal(kx, (B, IN_DIM), jnp.float32)
    params = init_params(kp)

    # Force the Pallas path so the kernel is exercised even at this tiny B.
    out = net_forward(x, params, use_pallas=True)
    out = jax.block_until_ready(out)

    # Reference: same math with the same bf16-rounded parameters/input.
    params_q = {k: v.astype(jnp.bfloat16).astype(jnp.float32)
                for k, v in params.items()}
    x_q = x.astype(jnp.bfloat16).astype(jnp.float32)
    ref = net_forward_ref(x_q, params_q)

    assert out.shape == (B, OUT_DIM)
    # Tolerances account for bf16 storage, MXU default precision and the
    # approximate (EUP) reciprocal in the softmax.
    assert jnp.allclose(out, ref, atol=2e-2, rtol=2e-2)
    assert jnp.allclose(jnp.sum(out, axis=1), 1.0, atol=2e-2)

    print("KERNEL_OK")
</pallas_src>

<mosaic_0001>
module attributes {stable_mosaic.version = 11 : i64} {
  func.func @_mlp_softmax_kernel(%arg0: i32, %arg1: memref<2x128xbf16, #tpu.memory_space<vmem>>, %arg2: memref<10x2xbf16, #tpu.memory_space<vmem>>, %arg3: memref<50x10xbf16, #tpu.memory_space<vmem>>, %arg4: memref<50x1xbf16, #tpu.memory_space<vmem>>, %arg5: memref<4x50xbf16, #tpu.memory_space<vmem>>, %arg6: memref<4x128xf32, #tpu.memory_space<vmem>>) attributes {dimension_semantics = [#tpu.dimension_semantics<parallel>], iteration_bounds = array<i64: 1>, scalar_prefetch = 0 : i64, scratch_operands = 0 : i64, tpu.core_type = #tpu.core_type<tc>, window_params = [{transform_indices = @transform_0, window_bounds = array<i64: 2, 128>}, {pipeline_mode = #tpu.pipeline_mode<synchronous>, transform_indices = @transform_1, window_bounds = array<i64: 10, 2>}, {pipeline_mode = #tpu.pipeline_mode<synchronous>, transform_indices = @transform_2, window_bounds = array<i64: 50, 10>}, {pipeline_mode = #tpu.pipeline_mode<synchronous>, transform_indices = @transform_3, window_bounds = array<i64: 50, 1>}, {pipeline_mode = #tpu.pipeline_mode<synchronous>, transform_indices = @transform_4, window_bounds = array<i64: 4, 50>}, {transform_indices = @transform_5, window_bounds = array<i64: 4, 128>}]} {
    %c0 = arith.constant 0 : index
    %c0_0 = arith.constant 0 : index
    %0 = vector.load %arg1[%c0, %c0_0] : memref<2x128xbf16, #tpu.memory_space<vmem>>, vector<2x128xbf16>
    %1 = arith.extf %0 : vector<2x128xbf16> to vector<2x128xf32>
    %c0_1 = arith.constant 0 : index
    %c0_2 = arith.constant 0 : index
    %2 = vector.load %arg2[%c0_1, %c0_2] : memref<10x2xbf16, #tpu.memory_space<vmem>>, vector<10x2xbf16>
    %3 = arith.extf %2 : vector<10x2xbf16> to vector<10x2xf32>
    %4 = vector.extract_strided_slice %3 {offsets = [0, 0], sizes = [10, 1], strides = [1, 1]} : vector<10x2xf32> to vector<10x1xf32>
    %5 = vector.extract_strided_slice %1 {offsets = [0, 0], sizes = [1, 128], strides = [1, 1]} : vector<2x128xf32> to vector<1x128xf32>
    %6 = vector.broadcast %4 : vector<10x1xf32> to vector<10x128xf32>
    %7 = vector.broadcast %5 : vector<1x128xf32> to vector<10x128xf32>
    %8 = arith.mulf %6, %7 : vector<10x128xf32>
    %9 = vector.extract_strided_slice %3 {offsets = [0, 1], sizes = [10, 1], strides = [1, 1]} : vector<10x2xf32> to vector<10x1xf32>
    %10 = vector.extract_strided_slice %1 {offsets = [1, 0], sizes = [1, 128], strides = [1, 1]} : vector<2x128xf32> to vector<1x128xf32>
    %11 = vector.broadcast %9 : vector<10x1xf32> to vector<10x128xf32>
    %12 = vector.broadcast %10 : vector<1x128xf32> to vector<10x128xf32>
    %13 = arith.mulf %11, %12 : vector<10x128xf32>
    %14 = arith.addf %8, %13 : vector<10x128xf32>
    %cst = arith.constant 0.000000e+00 : f32
    %15 = vector.broadcast %cst : f32 to vector<10x128xf32>
    %16 = arith.maximumf %14, %15 : vector<10x128xf32>
    %c0_3 = arith.constant 0 : index
    %c0_4 = arith.constant 0 : index
    %17 = vector.load %arg3[%c0_3, %c0_4] : memref<50x10xbf16, #tpu.memory_space<vmem>>, vector<50x10xbf16>
    %18 = arith.extf %17 : vector<50x10xbf16> to vector<50x10xf32>
    %cst_5 = arith.constant dense<0.000000e+00> : vector<50x128xf32>
    %19 = tpu.matmul %18, %16, %cst_5 {dimension_numbers = #tpu.dot_dimension_numbers<[1], [0], [0], [1], [0, 0, 1, 1], [], []>} : vector<50x10xf32>, vector<10x128xf32>, vector<50x128xf32> -> vector<50x128xf32>
    %c0_6 = arith.constant 0 : index
    %c0_7 = arith.constant 0 : index
    %20 = vector.load %arg4[%c0_6, %c0_7] : memref<50x1xbf16, #tpu.memory_space<vmem>>, vector<50x1xbf16>
    %21 = arith.extf %20 : vector<50x1xbf16> to vector<50x1xf32>
    %22 = vector.broadcast %21 : vector<50x1xf32> to vector<50x128xf32>
    %23 = arith.addf %19, %22 : vector<50x128xf32>
    %cst_8 = arith.constant 0.000000e+00 : f32
    %24 = vector.broadcast %cst_8 : f32 to vector<50x128xf32>
    %25 = arith.maximumf %23, %24 : vector<50x128xf32>
    %c0_9 = arith.constant 0 : index
    %c0_10 = arith.constant 0 : index
    %26 = vector.load %arg5[%c0_9, %c0_10] : memref<4x50xbf16, #tpu.memory_space<vmem>>, vector<4x50xbf16>
    %27 = arith.extf %26 : vector<4x50xbf16> to vector<4x50xf32>
    %cst_11 = arith.constant dense<0.000000e+00> : vector<4x128xf32>
    %28 = tpu.matmul %27, %25, %cst_11 {dimension_numbers = #tpu.dot_dimension_numbers<[1], [0], [0], [1], [0, 0, 1, 1], [], []>} : vector<4x50xf32>, vector<50x128xf32>, vector<4x128xf32> -> vector<4x128xf32>
    %cst_12 = arith.constant dense<0xFF800000> : vector<128xf32>
    %29 = vector.multi_reduction <maximumf>, %28, %cst_12 [0] : vector<4x128xf32> to vector<128xf32>
    %30 = vector.shape_cast %29 : vector<128xf32> to vector<1x128xf32>
    %31 = vector.broadcast %30 : vector<1x128xf32> to vector<4x128xf32>
    %32 = arith.subf %28, %31 : vector<4x128xf32>
    %33 = math.exp %32 : vector<4x128xf32>
    %cst_13 = arith.constant dense<0.000000e+00> : vector<128xf32>
    %34 = vector.multi_reduction <add>, %33, %cst_13 [0] : vector<4x128xf32> to vector<128xf32>
    %35 = vector.shape_cast %34 : vector<128xf32> to vector<1x128xf32>
    %36 = tpu.reciprocal %35 {approx = true} : vector<1x128xf32> -> vector<1x128xf32>
    %37 = vector.broadcast %36 : vector<1x128xf32> to vector<4x128xf32>
    %38 = arith.mulf %33, %37 : vector<4x128xf32>
    %c0_14 = arith.constant 0 : index
    %c0_15 = arith.constant 0 : index
    %39 = vector.load %arg6[%c0_14, %c0_15] : memref<4x128xf32, #tpu.memory_space<vmem>>, vector<4x128xf32>
    tpu.vector_store %arg6[%c0_14, %c0_15], %38 {strides = array<i32>} : memref<4x128xf32, #tpu.memory_space<vmem>>, vector<4x128xf32>,
    return
  }
  func.func @transform_0(%arg0: i32) -> (i32, i32) {
    %c0_i32 = arith.constant 0 : i32
    %c0_i32_0 = arith.constant 0 : i32
    return %c0_i32, %arg0 : i32, i32
  }
  func.func @transform_1(%arg0: i32) -> (i32, i32) {
    %c0_i32 = arith.constant 0 : i32
    %c0_i32_0 = arith.constant 0 : i32
    %c0_i32_1 = arith.constant 0 : i32
    return %c0_i32, %c0_i32_0 : i32, i32
  }
  func.func @transform_2(%arg0: i32) -> (i32, i32) {
    %c0_i32 = arith.constant 0 : i32
    %c0_i32_0 = arith.constant 0 : i32
    %c0_i32_1 = arith.constant 0 : i32
    return %c0_i32, %c0_i32_0 : i32, i32
  }
  func.func @transform_3(%arg0: i32) -> (i32, i32) {
    %c0_i32 = arith.constant 0 : i32
    %c0_i32_0 = arith.constant 0 : i32
    %c0_i32_1 = arith.constant 0 : i32
    return %c0_i32, %c0_i32_0 : i32, i32
  }
  func.func @transform_4(%arg0: i32) -> (i32, i32) {
    %c0_i32 = arith.constant 0 : i32
    %c0_i32_0 = arith.constant 0 : i32
    %c0_i32_1 = arith.constant 0 : i32
    return %c0_i32, %c0_i32_0 : i32, i32
  }
  func.func @transform_5(%arg0: i32) -> (i32, i32) {
    %c0_i32 = arith.constant 0 : i32
    %c0_i32_0 = arith.constant 0 : i32
    return %c0_i32, %arg0 : i32, i32
  }
}

</mosaic_0001>

<bundles_post_ra>
// kernel: tpu_custom_call.1
= control target key start
LH: loop header
LB: loop body
LE: loop exit
PB: predicated region body
PF: predicated region fallthrough
CT: control target
= control target key end

     0   :  { %v513_v2 = vmov 0   ;;  %s621_s0 = inlined_call_operand.vmem [shape: bf16[2,128], index: 0, kind: input, shape index: {}]   ;;  %s622_s1 = inlined_call_operand.vmem [shape: bf16[10,2], index: 1, kind: input, shape index: {}]   ;;  %s623_s2 = inlined_call_operand.vmem [shape: bf16[50,10], index: 2, kind: input, shape index: {}]   ;;  %s624_s3 = inlined_call_operand.vmem [shape: bf16[50,1], index: 3, kind: input, shape index: {}]   ;;  %s625_s4 = inlined_call_operand.vmem [shape: bf16[4,50], index: 4, kind: input, shape index: {}]   ;;  %s626_s5 = inlined_call_operand.hbm [shape: f32[4,128], index: 5, kind: output, shape index: {}]  }
   0x1   :  { %v23_v0 = vld [vmem:[%s622_s1] sm:$0xf]  ;;  %v24_v1 = vld [vmem:[%s622_s1 + $0x4] sm:$0x1]  ;;  %473 = vset.pattern.permute.xlu0 %v513_v2  ;;  %485 = vset.pattern.permute.xlu1 %v513_v2 }
   0x2   :  { %v25_v3 = vunpack.c.l.bf16 %v23_v0  ;;  %v26_v4 = vunpack.c.l.bf16 %v24_v1 }
   0x3   :  { %10 = vsyncpa [#allocation3], 0  ;;  %v514_v6 = vmov 1   ;;  %v515_v7 = vmov 0.0   ;;  %vm516_vm0 = vmmov 0   ;;  %v408_v9 = vld [vmem:[%s624_s3 + $0x10] sm:$0xff]   ;;  %v37_v19 = vlaneseq }
   0x4   :  { %v474_v5 = vpack.i.bf16 %v25_v3, %v26_v4  ;;  %426 = vmatprep.subr.mxu0 %v515_v7  ;;  %451 = vmatprep.subr.mxu1 %v515_v7  ;;  %v81_v8 = vld [vmem:[%s624_s3 + $0x18] sm:$0x1]  ;;  %v407_v10 = vld [vmem:[%s624_s3 + $0x8] sm:$0xff]   ;;  %v394_v13 = vld [vmem:[%s624_s3] sm:$0xff]   ;;  %v404_v14 = vunpack.c.h.bf16 %v408_v9  ;;  %v403_v16 = vunpack.c.l.bf16 %v408_v9  ;;  %vm146_vm1 = vcmask 1041408  }
   0x5   :  { %430 = vmatprep.mubr.msk.f32.mxu0 %vm516_vm0, %v515_v7  ;;  %465 = vmatprep.mubr.msk.f32.mxu1 %vm516_vm0, %v515_v7  ;;  %v88_v11 = vunpack.c.l.bf16 %v81_v8  ;;  %v400_v12 = vunpack.c.h.bf16 %v407_v10  ;;  %v395_v15 = vunpack.c.l.bf16 %v394_v13  ;;  %v399_v17 = vunpack.c.l.bf16 %v407_v10  ;;  %v21_v21 = vld [vmem:[%s621_s0] sm:$0x1]  ;;  %v405_v44 = vld [vmem:[%s623_s2 + $0x8] sm:$0xff]   ;;  %v406_v47 = vld [vmem:[%s623_s2 + $0x10] sm:$0xff]  }
   0x6   :  { %475 = vperm.xlu0 %473, %v474_v5   ;;  %v396_v18 = vunpack.c.h.bf16 %v394_v13  ;;  %v38_v20 = vshrl.u32 %v37_v19, 7  ;;  %v22_v24 = vunpack.c.l.bf16 %v21_v21  ;;  %v382_v39 = vld [vmem:[%s623_s2] sm:$0xff]   ;;  %vm124_vm2 = vcmask 80896   ;;  %v67_v50 = vld [vmem:[%s623_s2 + $0x18] sm:$0x1] }
   0x7   :  { %121 = vperm.xlu1 %485, %v88_v11   ;;  %v383_v41 = vunpack.c.l.bf16 %v382_v39  ;;  %v384_v43 = vunpack.c.h.bf16 %v382_v39  ;;  %v387_v45 = vunpack.c.l.bf16 %v405_v44  ;;  %v388_v46 = vunpack.c.h.bf16 %v405_v44 }
   0x8   :  { %v39_v22 = vsub.s32 0, %v38_v20  ;;  %v53_v25 = vsub.s32 1, %v38_v20  ;;  %v391_v48 = vunpack.c.l.bf16 %v406_v47  ;;  %v392_v49 = vunpack.c.h.bf16 %v406_v47 }
   0x9   :  { %v74_v51 = vunpack.c.l.bf16 %v67_v50  ;;  %vm259_vm3 = vcmask 408576   ;;  %vm336_vm4 = vcmask 1043456  }
   0xa   :  { %479 = vset.pattern.permute.xlu0 %v514_v6  ;;  %v40_v28 = vrot.slane %v22_v24, %v39_v22  ;;  %v54_v29 = vrot.slane %v22_v24, %v53_v25  ;;  %v257_v22 = vld [vmem:[%s625_s4] sm:$0x3]  ;;  %s517_s4 = smov [#allocation2]  }
   0xb   :  { %481 = vperm.xlu0 %479, %v474_v5   ;;  %116 = vperm.xlu1 %485, %v404_v14   ;;  %v258_v24 = vunpack.c.l.bf16 %v257_v22  ;;  %s363_s13 = sshll.u32 %s517_s4, 4  ;;  %s364_s13 = int_to_ptr.vmem [resolvable:$true] %s363_s13 }
   0xc   :  { %s491_s14 = scalar_lea.vmem %s364_s13, 64  ;;  %p496_p1 = scmp.lt.s32.totalorder %s364_s13, %s364_s13 }
   0xd   :  { %p492_p0 = scmp.ne.s32.totalorder %s364_s13, %s491_s14  ;;  %p497_p2 = scmp.lt.s32.totalorder %s491_s14, %s491_s14 }
   0xf   :  { %486 = vset.pattern.permute.xlu0 %v513_v2  ;;  %111 = vperm.xlu1 %485, %v403_v16   ;;  %p498_p3 = por %p497_p2, %p496_p1 }
  0x10   :  { %106 = vperm.xlu0 %486, %v400_v12  }
  0x11   :  { %p499_p4 = pnand %p498_p3, %p492_p0 }
  0x13   :  { %101 = vperm.xlu1 %485, %v399_v17  }
  0x14   :  { %91 = vperm.xlu0 %486, %v395_v15  }
  0x17   :  { %96 = vperm.xlu1 %485, %v396_v18  }
  0x81   :  { %v476_v23 = vpop.permute.xlu0 %475 }
  0x82   :  { %v478_v26 = vunpack.i.h.bf16 %v476_v23  ;;  %v477_v27 = vunpack.i.l.bf16 %v476_v23  ;;  %v122_v55 = vpop.permute.xlu1 %121 }
  0x84   :  { %v41_v33 = vmul.f32 %v478_v26, %v40_v28  ;;  %v42_v34 = vmul.f32 %v477_v27, %v40_v28 }
  0x86   :  { %v482_v30 = vpop.permute.xlu0 %481  ;;  %v117_v59 = vpop.permute.xlu1 %116 }
  0x87   :  { %v484_v31 = vunpack.i.h.bf16 %v482_v30  ;;  %v483_v32 = vunpack.i.l.bf16 %v482_v30 }
  0x89   :  { %v55_v35 = vmul.f32 %v484_v31, %v54_v29  ;;  %v56_v36 = vmul.f32 %v483_v32, %v54_v29 }
  0x8a   :  { %v112_v63 = vpop.permute.xlu1 %111 }
  0x8b   :  { %v58_v37 = vadd.f32 %v56_v36, %v42_v34  ;;  %v57_v38 = vadd.f32 %v55_v35, %v41_v33  ;;  %v107_v8 = vpop.permute.xlu0 %106 }
  0x8d   :  { %v60_v40 = vmax.f32 %v58_v37, 0.0  ;;  %v59_v42 = vmax.f32 %v57_v38, 0.0 }
  0x8e   :  { %v102_v3 = vpop.permute.xlu1 %101 }
  0x8f   :  { %427 = vmatpush3.msk.msra.mxu0 %vm146_vm1, %v60_v40  ;;  %v92_v17 = vpop.permute.xlu0 %91 }
  0x90   :  { %428 = vmatprep.subr.mxu0 %v515_v7 }
  0x91   :  { %429 = vmatpush3.msra.mxu0 %v59_v42 }
  0x92   :  { %431 = vmatmul.mubr.msk.f32.vlgmr.msra.gmra.mxu0 %vm124_vm2, %v383_v41  ;;  %v97_v14 = vpop.permute.xlu1 %96 }
  0x93   :  { %433 = vmatprep.mubr.msk.f32.mxu0 %vm516_vm0, %v515_v7 }
  0x96   :  { %434 = vmatmul.mubr.msk.f32.gmra.mxu0 %vm124_vm2, %v384_v43 }
  0x97   :  { %436 = vmatprep.mubr.msk.f32.mxu0 %vm516_vm0, %v515_v7 }
  0x9a   :  { %437 = vmatmul.mubr.msk.f32.gmra.mxu0 %vm124_vm2, %v387_v45 }
  0x9b   :  { %439 = vmatprep.mubr.msk.f32.mxu0 %vm516_vm0, %v515_v7 }
  0x9e   :  { %440 = vmatmul.mubr.msk.f32.gmra.mxu0 %vm124_vm2, %v388_v46 }
  0x9f   :  { %442 = vmatprep.mubr.msk.f32.mxu0 %vm516_vm0, %v515_v7 }
  0xa2   :  { %443 = vmatmul.mubr.msk.f32.gmra.mxu0 %vm124_vm2, %v391_v48 }
  0xa3   :  { %445 = vmatprep.mubr.msk.f32.mxu0 %vm516_vm0, %v515_v7 }
  0xa6   :  { %446 = vmatmul.mubr.msk.f32.gmra.mxu0 %vm124_vm2, %v392_v49 }
  0xa7   :  { %448 = vmatprep.mubr.msk.f32.mxu0 %vm516_vm0, %v515_v7 }
  0xaa   :  { %449 = vmatmul.mubr.msk.f32.gmra.mxu0 %vm124_vm2, %v74_v51 }
 0x152   :  { %v216_v52 = vpop.f32.mrf.mxu0 }
 0x153   :  { %v217_v20 = vadd.f32 %v216_v52, %v92_v17 }
 0x154   :  { %v432_v53 = vpop.f32.mrf.mxu0 }
 0x155   :  { %v250_v25 = vmax.f32 %v217_v20, 0.0 }
 0x156   :  { %v221_v54 = vpop.f32.mrf.mxu0 }
 0x157   :  { %v222_v18 = vadd.f32 %v221_v54, %v97_v14 }
 0x158   :  { %v435_v56 = vpop.f32.mrf.mxu0 }
 0x159   :  { %v251_v23 = vmax.f32 %v222_v18, 0.0 }
 0x15a   :  { %v226_v57 = vpop.f32.mrf.mxu0 }
 0x15b   :  { %v227_v15 = vadd.f32 %v226_v57, %v102_v3 }
 0x15c   :  { %v438_v58 = vpop.f32.mrf.mxu0 }
 0x15d   :  { %v252_v21 = vmax.f32 %v227_v15, 0.0 }
 0x15e   :  { %v231_v60 = vpop.f32.mrf.mxu0 }
 0x15f   :  { %v232_v12 = vadd.f32 %v231_v60, %v107_v8 }
 0x160   :  { %v441_v61 = vpop.f32.mrf.mxu0 }
 0x161   :  { %v253_v19 = vmax.f32 %v232_v12, 0.0 }
 0x162   :  { %v236_v62 = vpop.f32.mrf.mxu0 }
 0x163   :  { %v237_v10 = vadd.f32 %v236_v62, %v112_v63 }
 0x164   :  { %v444_v0 = vpop.f32.mrf.mxu0 }
 0x165   :  { %v254_v16 = vmax.f32 %v237_v10, 0.0 }
 0x166   :  { %v241_v1 = vpop.f32.mrf.mxu0 }
 0x167   :  { %v242_v5 = vadd.f32 %v241_v1, %v117_v59 }
 0x168   :  { %v447_v2 = vpop.f32.mrf.mxu0 }
 0x169   :  { %v255_v13 = vmax.f32 %v242_v5, 0.0 }
 0x16a   :  { %v246_v4 = vpop.f32.mrf.mxu0 }
 0x16b   :  { %v247_v6 = vadd.f32 %v246_v4, %v122_v55 }
 0x16c   :  { %v450_v9 = vpop.f32.mrf.mxu0 }
 0x16d   :  { %v256_v11 = vmax.f32 %v247_v6, 0.0 }
 0x16f   :  { %452 = vmatpush3.msk.msra.mxu1 %vm146_vm1, %v256_v11 }
 0x170   :  { %453 = vmatprep.subr.mxu1 %v515_v7 }
 0x171   :  { %454 = vmatpush3.msra.mxu1 %v255_v13 }
 0x172   :  { %455 = vmatprep.subr.mxu1 %v515_v7 }
 0x173   :  { %456 = vmatpush3.msra.mxu1 %v254_v16 }
 0x174   :  { %457 = vmatprep.subr.mxu1 %v515_v7 }
 0x175   :  { %458 = vmatpush3.msra.mxu1 %v253_v19 }
 0x176   :  { %459 = vmatprep.subr.mxu1 %v515_v7 }
 0x177   :  { %460 = vmatpush3.msra.mxu1 %v252_v21 }
 0x178   :  { %461 = vmatprep.subr.mxu1 %v515_v7 }
 0x179   :  { %462 = vmatpush3.msra.mxu1 %v251_v23 }
 0x17a   :  { %463 = vmatprep.subr.mxu1 %v515_v7 }
 0x17b   :  { %464 = vmatpush3.msra.mxu1 %v250_v25 }
 0x17c   :  { %466 = vmatmul.mubr.msk.f32.vlgmr.msra.gmra.mxu1 %vm259_vm3, %v258_v24 }
 0x23c   :  { %v332_v26 = vpop.f32.mrf.mxu1 }
 0x23d   :  { %v337_v27 = vsel %vm336_vm4, %v332_v26, -inf }
 0x23e   :  { %v338_v28 = vrot.slane %v337_v27, 4  ;;  %v467_v29 = vpop.f32.mrf.mxu1 }
 0x240   :  { %v339_v30 = vmax.f32 %v337_v27, %v338_v28 }
 0x242   :  { %v340_v31 = vrot.slane %v339_v30, 2 }
 0x244   :  { %v341_v32 = vmax.f32 %v339_v30, %v340_v31 }
 0x246   :  { %v342_v33 = vrot.slane %v341_v32, 1 }
 0x248   :  { %v343_v34 = vmax.f32 %v341_v32, %v342_v33 }
 0x24a   :  { %v344_v35 = vsub.f32 %v332_v26, %v343_v34 }
 0x24c   :  { %v345_v36 = vmul.f32 1.442695, %v344_v35 }
 0x24e   :  { %487 = vpow2.f32 %v345_v36 }
 0x25b   :  { %v488_v37 = vpop.eup %487 }
 0x25c   :  { %v347_v38 = vsel %vm336_vm4, %v488_v37, 0.0 }
 0x25d   :  { %v348_v39 = vrot.slane %v347_v38, 4 }
 0x25f   :  { %v349_v40 = vadd.f32 %v348_v39, %v347_v38 }
 0x261   :  { %v350_v7 = vrot.slane %v349_v40, 2 }
 0x263   :  { %v351_v41 = vadd.f32 %v350_v7, %v349_v40 }
 0x265   :  { %v352_v42 = vrot.slane %v351_v41, 1 }
 0x267   :  { %v353_v43 = vadd.f32 %v352_v42, %v351_v41 }
 0x269   :  { %489 = vrcp.f32 %v353_v43 }
 0x276   :  { %v490_v44 = vpop.eup %489 }
 0x277   :  { %v355_v45 = vmul.f32 %v490_v44, %v488_v37 }
 0x279   :  { %356 = vst [vmem:[#allocation2] sm:$0xf] %v355_v45 }
 0x27a   :  { %502 = shalt.err (!%p499_p4)
}
 0x27b   :  { %366 = dma.vmem_to_hbm [thread:$0]  %s364_s13, 64, %s626_s5, [#allocation3]  }
 0x27c   :  { %511 = dma.done.wait [#allocation3], 64  }
 0x27d   :  { %512 = vsyncadd [#allocation3], 4294967232 }
 0x27e   :  { %370 = vsyncpa [#allocation3], 1 }

</bundles_post_ra>
